<compile_context>
chip_gen: v6e
topology: v6e:2x2x1
jax: 0.10.0
libtpu: 0.0.40
codegen_flags: <defaults>
</compile_context>

<pallas_src>
import functools

import numpy as np

import jax
import jax.numpy as jnp
from jax import lax
from jax.experimental import pallas as pl
from jax.experimental.pallas import tpu as pltpu

KH = KW = 4   # kernel_size
STRIDE = 2
PAD = 1


def _conv_tap_kernel(x_ref, w_ref, b_ref, o_ref, *, Bt, Ws, L_out):
    # x_ref: (Bt, 1, L_in, C4)   flattened s2d rows (incl. 2 halo rows), C4 = 4*Cin
    # w_ref: (4, Cout, C4)       folded weights, tap-major
    # b_ref: (Cout, 1)           f32 bias
    # o_ref: (Bt, 1, Cout, L_out)
    bias = b_ref[...]                              # (Cout, 1) f32
    shifts = (0, 1, Ws, Ws + 1)                    # taps (ph, pw) = (0,0),(0,1),(1,0),(1,1)
    for b in range(Bt):                            # Bt is small (<= 8): static unroll
        acc = None
        for t, s in enumerate(shifts):
            # Contiguous 2-D window of the VMEM-resident block: no reshape, no concat,
            # no materialized im2col slab.
            xt = x_ref[b, 0, pl.ds(s, L_out), :]                          # (L_out, C4)
            # (Cout, C4) . (L_out, C4)^T -> (Cout, L_out): pixel axis last => lane-dense.
            p = lax.dot_general(w_ref[t], xt, (((1,), (1,)), ((), ())),
                                preferred_element_type=jnp.float32)
            acc = p if acc is None else acc + p
        o_ref[b, 0] = (acc + bias).astype(o_ref.dtype)


def _vmem_params():
    """(block-sizing budget bytes, compiler vmem_limit_bytes), per TPU generation."""
    try:
        cap = getattr(pltpu.get_tpu_info(), "vmem_capacity_bytes", None)
    except Exception:
        cap = None
    if cap is None:
        cap = 64 * 1024 * 1024                     # conservative: assume v7x-sized VMEM
    if cap >= 96 * 1024 * 1024:                    # v5e / v6e: 128 MiB physical VMEM
        return 48 * 1024 * 1024, 96 * 1024 * 1024
    # v7x (64 MiB per TensorCore) or unknown smaller parts: scale with capacity.
    return max(8 * 1024 * 1024, int(cap * 0.30)), max(16 * 1024 * 1024, int(cap * 0.70))


def reflect_conv_pallas(x_nchw, weight_oihw, bias, *, compute_dtype=jnp.bfloat16):
    """Forward pass of reflect_conv.  x_nchw: (B, Cin, H, W) -> (B, Cout, Ho, Wo)."""
    B, Cin, H, W = x_nchw.shape
    Cout = weight_oihw.shape[0]
    out_dtype = x_nchw.dtype

    Hp, Wp = H + 2 * PAD, W + 2 * PAD
    Ho = (Hp - KH) // STRIDE + 1
    Wo = (Wp - KW) // STRIDE + 1

    # Reflection pad in NCHW, then pad spatial to even so stride-2 s2d is exact
    # (the extra zero row/col is only read by discarded edge outputs).
    x_pad = jnp.pad(x_nchw, ((0, 0), (0, 0), (PAD, PAD), (PAD, PAD)), mode="reflect")
    He, We = Hp + (Hp % 2), Wp + (Wp % 2)
    if (He, We) != (Hp, Wp):
        x_pad = jnp.pad(x_pad, ((0, 0), (0, 0), (0, He - Hp), (0, We - Wp)))
    Hs, Ws = He // 2, We // 2
    C4 = 4 * Cin

    # ONE fused transpose: padded NCHW -> (B, Hs, Ws, dh, dw, c) -> (B, Hs, Ws, 4*Cin).
    # TODO(synk): if the surrounding model runs NHWC end-to-end, this boundary relayout
    # (and the tiny output shuffle below) can be dropped entirely.
    x_s2d = x_pad.reshape(B, Cin, Hs, 2, Ws, 2).transpose(0, 2, 4, 3, 5, 1)
    x_s2d = x_s2d.reshape(B, Hs, Ws, C4).astype(compute_dtype)

    # Fold weights: (Cout, Cin, 4, 4) -> (tap=(ph,pw), Cout, (dh,dw,c)).
    w_t = weight_oihw.reshape(Cout, Cin, 2, 2, 2, 2).transpose(2, 4, 0, 3, 5, 1)
    w_t = w_t.reshape(4, Cout, C4).astype(compute_dtype)
    b2 = bias.reshape(Cout, 1).astype(jnp.float32)

    # ---- per-generation tile sizing ----
    budget, vmem_limit = _vmem_params()
    itemsize = jnp.dtype(compute_dtype).itemsize
    out_itemsize = jnp.dtype(out_dtype).itemsize
    row_in = Ws * C4 * itemsize
    row_out = Ws * Cout
    # ~3 live copies of the input rows (double-buffered DMA + shifted tap), f32
    # accumulator, double-buffered output block.
    bytes_per_row = 3 * row_in + 4 * row_out + 2 * out_itemsize * row_out
    max_rows = max(4, int(budget // bytes_per_row))

    if max_rows >= Ho + 2:
        if B == 1 and Ho >= 2:
            n_rt = min(Ho, 4)                      # keep >= 2 "parallel" steps (megacore)
            Rt = -(-Ho // n_rt)
            n_rt = -(-Ho // Rt)
            Bt = 1
        else:
            Rt, n_rt = Ho, 1
            Bt = max(1, min(B, max_rows // (Ho + 2), 8))
            if B >= 2:                             # keep batch grid axis >= 2 (v7x: 2 TCs)
                Bt = min(Bt, -(-B // 2))
    else:
        Rt = int(min(Ho, max(1, max_rows - 2)))    # spatial tiling bounds per-step VMEM
        n_rt = -(-Ho // Rt)
        Bt = 1

    G_b = -(-B // Bt)
    B_pad = G_b * Bt
    L_in = (Rt + 2) * Ws
    L_out = Rt * Ws

    # ---- row-tiled input with a 2-row halo (clamped; garbage only feeds discarded outputs) ----
    if n_rt == 1:
        need = Rt + 2
        x_t = (jnp.pad(x_s2d, ((0, 0), (0, need - Hs), (0, 0), (0, 0)))
               if need > Hs else x_s2d[:, :need])
        x_tiled = x_t.reshape(B, 1, L_in, C4)
    else:
        row_idx = np.arange(n_rt)[:, None] * Rt + np.arange(Rt + 2)[None, :]
        row_idx = np.minimum(row_idx, Hs - 1).reshape(-1)
        x_tiled = jnp.take(x_s2d, jnp.asarray(row_idx), axis=1)
        x_tiled = x_tiled.reshape(B, n_rt, L_in, C4)
    if B_pad != B:
        x_tiled = jnp.pad(x_tiled, ((0, B_pad - B), (0, 0), (0, 0), (0, 0)))

    kernel = functools.partial(_conv_tap_kernel, Bt=Bt, Ws=Ws, L_out=L_out)
    flops = 2 * B_pad * n_rt * 4 * Cout * L_out * C4
    bytes_accessed = (x_tiled.size * itemsize + w_t.size * itemsize + b2.size * 4
                      + B_pad * n_rt * Cout * L_out * out_itemsize)

    out = pl.pallas_call(
        kernel,
        out_shape=jax.ShapeDtypeStruct((B_pad, n_rt, Cout, L_out), out_dtype),
        grid_spec=pltpu.PrefetchScalarGridSpec(
            num_scalar_prefetch=0,
            grid=(G_b, n_rt),
            in_specs=[
                # TODO(synk): if xprof shows exposed input DMA, add
                # pipeline_mode=pl.Buffered(3) on this (large) spec only.
                pl.BlockSpec((Bt, 1, L_in, C4), lambda b, r: (b, r, 0, 0)),
                pl.BlockSpec((4, Cout, C4), lambda b, r: (0, 0, 0)),
                pl.BlockSpec((Cout, 1), lambda b, r: (0, 0)),
            ],
            out_specs=pl.BlockSpec((Bt, 1, Cout, L_out), lambda b, r: (b, r, 0, 0)),
        ),
        compiler_params=pltpu.CompilerParams(
            dimension_semantics=("parallel", "parallel"),
            vmem_limit_bytes=vmem_limit,
        ),
        cost_estimate=pl.CostEstimate(flops=flops, transcendentals=0,
                                      bytes_accessed=bytes_accessed),
    )(x_tiled, w_t, b2)

    # Un-tile: (B_pad, n_rt, Cout, Rt*Ws) -> (B, Cout, Ho, Wo).  Results are already
    # channel-major, so only a cheap leading-axis shuffle remains (no NHWC->NCHW pass).
    out = out.reshape(B_pad, n_rt, Cout, Rt, Ws).transpose(0, 2, 1, 3, 4)
    out = out.reshape(B_pad, Cout, n_rt * Rt, Ws)[:B, :, :Ho, :Wo]
    return out


def reflect_conv_reference(x_nchw, weight_oihw, bias):
    """Pure-JAX reference (matches PyTorch semantics)."""
    x_pad = jnp.pad(x_nchw, ((0, 0), (0, 0), (PAD, PAD), (PAD, PAD)), mode="reflect")
    out = lax.conv_general_dilated(
        x_pad, weight_oihw,
        window_strides=(STRIDE, STRIDE),
        padding="VALID",
        dimension_numbers=("NCHW", "OIHW", "NCHW"),
        precision=lax.Precision.HIGHEST,
    )
    return out + bias.reshape(1, -1, 1, 1)


if __name__ == "__main__":
    key = jax.random.PRNGKey(0)
    B, Cin, H, W = 2, 4, 16, 16
    Cout = 8

    kx, kw, kb = jax.random.split(key, 3)
    x = jax.random.normal(kx, (B, Cin, H, W), dtype=jnp.float32)
    fan_in = Cin * KH * KW
    bound = 1.0 / (fan_in ** 0.5)
    weight = jax.random.uniform(kw, (Cout, Cin, KH, KW), jnp.float32, -bound, bound)
    bias = jax.random.uniform(kb, (Cout,), jnp.float32, -bound, bound)

    ref = jax.block_until_ready(reflect_conv_reference(x, weight, bias))

    # f32-operand path: exact module semantics.
    fwd_f32 = jax.jit(functools.partial(reflect_conv_pallas, compute_dtype=jnp.float32))
    out_f32 = jax.block_until_ready(fwd_f32(x, weight, bias))
    assert out_f32.shape == ref.shape == (B, Cout, 8, 8), (out_f32.shape, ref.shape)
    assert jnp.allclose(out_f32, ref, atol=1e-4, rtol=1e-4), \
        float(jnp.max(jnp.abs(out_f32 - ref)))

    # bf16-operand path (f32 accumulation): the recommended fast path on v5e/v6e/v7x.
    fwd_bf16 = jax.jit(functools.partial(reflect_conv_pallas, compute_dtype=jnp.bfloat16))
    out_bf16 = jax.block_until_ready(fwd_bf16(x, weight, bias))
    assert out_bf16.shape == ref.shape
    assert jnp.allclose(out_bf16, ref, atol=2e-2, rtol=2e-2), \
        float(jnp.max(jnp.abs(out_bf16 - ref)))

    print("KERNEL_OK")
</pallas_src>

<mosaic_0001>
module attributes {stable_mosaic.version = 11 : i64} {
  func.func @_conv_tap_kernel(%arg0: i32, %arg1: i32, %arg2: memref<1x1x90x16xf32, #tpu.memory_space<vmem>>, %arg3: memref<4x8x16xf32, #tpu.memory_space<vmem>>, %arg4: memref<8x1xf32, #tpu.memory_space<vmem>>, %arg5: memref<1x1x8x72xf32, #tpu.memory_space<vmem>>) attributes {dimension_semantics = [#tpu.dimension_semantics<parallel>, #tpu.dimension_semantics<parallel>], iteration_bounds = array<i64: 2, 1>, scalar_prefetch = 0 : i64, scratch_operands = 0 : i64, tpu.core_type = #tpu.core_type<tc>, window_params = [{transform_indices = @transform_0, window_bounds = array<i64: 1, 1, 90, 16>}, {pipeline_mode = #tpu.pipeline_mode<synchronous>, transform_indices = @transform_1, window_bounds = array<i64: 4, 8, 16>}, {pipeline_mode = #tpu.pipeline_mode<synchronous>, transform_indices = @transform_2, window_bounds = array<i64: 8, 1>}, {transform_indices = @transform_3, window_bounds = array<i64: 1, 1, 8, 72>}]} {
    %c0 = arith.constant 0 : index
    %c0_0 = arith.constant 0 : index
    %0 = vector.load %arg4[%c0, %c0_0] : memref<8x1xf32, #tpu.memory_space<vmem>>, vector<8x1xf32>
    %c0_1 = arith.constant 0 : index
    %c0_2 = arith.constant 0 : index
    %c0_3 = arith.constant 0 : index
    %c0_4 = arith.constant 0 : index
    %1 = vector.load %arg2[%c0_1, %c0_2, %c0_3, %c0_4] : memref<1x1x90x16xf32, #tpu.memory_space<vmem>>, vector<1x1x72x16xf32>
    %2 = vector.shape_cast %1 : vector<1x1x72x16xf32> to vector<72x16xf32>
    %c0_5 = arith.constant 0 : index
    %c0_6 = arith.constant 0 : index
    %c0_7 = arith.constant 0 : index
    %3 = vector.load %arg3[%c0_5, %c0_6, %c0_7] : memref<4x8x16xf32, #tpu.memory_space<vmem>>, vector<1x8x16xf32>
    %4 = vector.shape_cast %3 : vector<1x8x16xf32> to vector<8x16xf32>
    %cst = arith.constant dense<0.000000e+00> : vector<8x72xf32>
    %5 = tpu.matmul %4, %2, %cst {dimension_numbers = #tpu.dot_dimension_numbers<[1], [1], [0], [0], [0, 0, 1, 0], [], []>} : vector<8x16xf32>, vector<72x16xf32>, vector<8x72xf32> -> vector<8x72xf32>
    %c0_8 = arith.constant 0 : index
    %c0_9 = arith.constant 0 : index
    %c1 = arith.constant 1 : index
    %c0_10 = arith.constant 0 : index
    %6 = vector.load %arg2[%c0_8, %c0_9, %c1, %c0_10] : memref<1x1x90x16xf32, #tpu.memory_space<vmem>>, vector<1x1x72x16xf32>
    %7 = vector.shape_cast %6 : vector<1x1x72x16xf32> to vector<72x16xf32>
    %c1_11 = arith.constant 1 : index
    %c0_12 = arith.constant 0 : index
    %c0_13 = arith.constant 0 : index
    %8 = vector.load %arg3[%c1_11, %c0_12, %c0_13] : memref<4x8x16xf32, #tpu.memory_space<vmem>>, vector<1x8x16xf32>
    %9 = vector.shape_cast %8 : vector<1x8x16xf32> to vector<8x16xf32>
    %cst_14 = arith.constant dense<0.000000e+00> : vector<8x72xf32>
    %10 = tpu.matmul %9, %7, %cst_14 {dimension_numbers = #tpu.dot_dimension_numbers<[1], [1], [0], [0], [0, 0, 1, 0], [], []>} : vector<8x16xf32>, vector<72x16xf32>, vector<8x72xf32> -> vector<8x72xf32>
    %11 = arith.addf %5, %10 : vector<8x72xf32>
    %c0_15 = arith.constant 0 : index
    %c0_16 = arith.constant 0 : index
    %c9 = arith.constant 9 : index
    %c0_17 = arith.constant 0 : index
    %12 = vector.load %arg2[%c0_15, %c0_16, %c9, %c0_17] : memref<1x1x90x16xf32, #tpu.memory_space<vmem>>, vector<1x1x72x16xf32>
    %13 = vector.shape_cast %12 : vector<1x1x72x16xf32> to vector<72x16xf32>
    %c2 = arith.constant 2 : index
    %c0_18 = arith.constant 0 : index
    %c0_19 = arith.constant 0 : index
    %14 = vector.load %arg3[%c2, %c0_18, %c0_19] : memref<4x8x16xf32, #tpu.memory_space<vmem>>, vector<1x8x16xf32>
    %15 = vector.shape_cast %14 : vector<1x8x16xf32> to vector<8x16xf32>
    %cst_20 = arith.constant dense<0.000000e+00> : vector<8x72xf32>
    %16 = tpu.matmul %15, %13, %cst_20 {dimension_numbers = #tpu.dot_dimension_numbers<[1], [1], [0], [0], [0, 0, 1, 0], [], []>} : vector<8x16xf32>, vector<72x16xf32>, vector<8x72xf32> -> vector<8x72xf32>
    %17 = arith.addf %11, %16 : vector<8x72xf32>
    %c0_21 = arith.constant 0 : index
    %c0_22 = arith.constant 0 : index
    %c10 = arith.constant 10 : index
    %c0_23 = arith.constant 0 : index
    %18 = vector.load %arg2[%c0_21, %c0_22, %c10, %c0_23] : memref<1x1x90x16xf32, #tpu.memory_space<vmem>>, vector<1x1x72x16xf32>
    %19 = vector.shape_cast %18 : vector<1x1x72x16xf32> to vector<72x16xf32>
    %c3 = arith.constant 3 : index
    %c0_24 = arith.constant 0 : index
    %c0_25 = arith.constant 0 : index
    %20 = vector.load %arg3[%c3, %c0_24, %c0_25] : memref<4x8x16xf32, #tpu.memory_space<vmem>>, vector<1x8x16xf32>
    %21 = vector.shape_cast %20 : vector<1x8x16xf32> to vector<8x16xf32>
    %cst_26 = arith.constant dense<0.000000e+00> : vector<8x72xf32>
    %22 = tpu.matmul %21, %19, %cst_26 {dimension_numbers = #tpu.dot_dimension_numbers<[1], [1], [0], [0], [0, 0, 1, 0], [], []>} : vector<8x16xf32>, vector<72x16xf32>, vector<8x72xf32> -> vector<8x72xf32>
    %23 = arith.addf %17, %22 : vector<8x72xf32>
    %24 = vector.broadcast %0 : vector<8x1xf32> to vector<8x72xf32>
    %25 = arith.addf %23, %24 : vector<8x72xf32>
    %c0_27 = arith.constant 0 : index
    %c0_28 = arith.constant 0 : index
    %c0_29 = arith.constant 0 : index
    %c0_30 = arith.constant 0 : index
    %26 = vector.load %arg5[%c0_27, %c0_28, %c0_29, %c0_30] : memref<1x1x8x72xf32, #tpu.memory_space<vmem>>, vector<1x1x8x72xf32>
    %27 = vector.shape_cast %26 : vector<1x1x8x72xf32> to vector<8x72xf32>
    %28 = vector.shape_cast %25 : vector<8x72xf32> to vector<1x1x8x72xf32>
    tpu.vector_store %arg5[%c0_27, %c0_28, %c0_29, %c0_30], %28 {strides = array<i32>} : memref<1x1x8x72xf32, #tpu.memory_space<vmem>>, vector<1x1x8x72xf32>,
    return
  }
  func.func @transform_0(%arg0: i32, %arg1: i32) -> (i32, i32, i32, i32) {
    %c0_i32 = arith.constant 0 : i32
    %c0_i32_0 = arith.constant 0 : i32
    %c0_i32_1 = arith.constant 0 : i32
    return %arg0, %arg1, %c0_i32, %c0_i32_0 : i32, i32, i32, i32
  }
  func.func @transform_1(%arg0: i32, %arg1: i32) -> (i32, i32, i32) {
    %c0_i32 = arith.constant 0 : i32
    %c0_i32_0 = arith.constant 0 : i32
    %c0_i32_1 = arith.constant 0 : i32
    %c0_i32_2 = arith.constant 0 : i32
    return %c0_i32, %c0_i32_0, %c0_i32_1 : i32, i32, i32
  }
  func.func @transform_2(%arg0: i32, %arg1: i32) -> (i32, i32) {
    %c0_i32 = arith.constant 0 : i32
    %c0_i32_0 = arith.constant 0 : i32
    %c0_i32_1 = arith.constant 0 : i32
    return %c0_i32, %c0_i32_0 : i32, i32
  }
  func.func @transform_3(%arg0: i32, %arg1: i32) -> (i32, i32, i32, i32) {
    %c0_i32 = arith.constant 0 : i32
    %c0_i32_0 = arith.constant 0 : i32
    %c0_i32_1 = arith.constant 0 : i32
    return %arg0, %arg1, %c0_i32, %c0_i32_0 : i32, i32, i32, i32
  }
}

</mosaic_0001>

<bundles_post_ra>
// kernel: reflect_conv_pallas.1
= control target key start
LH: loop header
LB: loop body
LE: loop exit
PB: predicated region body
PF: predicated region fallthrough
CT: control target
= control target key end

     0   :  { %s990_s12 = smov 0   ;;  %s992_s13 = smov 0   ;;  %s1176_s0 = inlined_call_operand.vmem [shape: f32[2,1,90,16], index: 0, kind: input, shape index: {}]   ;;  %s1177_s1 = inlined_call_operand.vmem [shape: f32[4,8,16], index: 1, kind: input, shape index: {}]   ;;  %s1178_s2 = inlined_call_operand.vmem [shape: f32[8,1], index: 2, kind: input, shape index: {}]   ;;  %s1179_s3 = inlined_call_operand.vmem [shape: f32[2,1,8,72], index: 3, kind: output, shape index: {}]  }
   0x1   :  { %s994_s14 = smov 0  }
   0x2 LB: > { %s25_s15 = sadd.s32 1, %s961_s13  ;;  %p742_p0 = scmp.ge.s32.totalorder %s965_s14, 1  ;;  %s965_s14 = sphi %s994_s14, %s13_s14   ;;  %s961_s13 = sphi %s992_s13, %s1181_s13   ;;  %s957_s12 = sphi %s990_s12, %s1180_s12  }
   0x3   : > { %p27_p1 = scmp.ge.s32.totalorder %s25_s15, 2  ;;  %p157_p2 = scmp.lt.s32.totalorder %s965_s14, 3 }
   0x5   : > { %s1183_s15 = smov (%p27_p1, %s25_s15), 0  ;;  %p158_p3 = pnand %p742_p0, %p157_p2 }
   0x6   : > { %p187_p4 = scmp.lt.s32.totalorder (!%p158_p3), %s957_s12, 1 }
   0x7   : > { %161 = sbr.rel (%p158_p3) target bundleno = 288 (0x120), region = 32 }
   0xc   : > { %v967_v0 = vmov 0.0   ;;  %v203_v1 = vld [vmem:[%s1178_s2] sm:$0xff]  ;;  %s1185_s12 = smov (!%p187_p4, %s957_s12), 1  ;;  %vm968_vm0 = vmmov 0   ;;  %v969_v2 = vmov 0   ;;  %vm225_vm1 = vcmask 130048  }
   0xd   : > { %830 = vmatprep.subr.mxu0 %v967_v0  ;;  %851 = vmatprep.subr.mxu1 %v967_v0  ;;  %s914_s18 = smul.u32 96, %s1185_s12  ;;  %v745_v21 = vld [vmem:[%s1177_s1 + $0x8] sm:$0xff]  ;;  %v213_v22 = vld [vmem:[%s1177_s1] sm:$0xff]  ;;  %v766_v33 = vld [vmem:[%s1177_s1 + $0x10] sm:$0xff]  ;;  %s744_s30 = sshll.u32 %s1185_s12, 3  ;;  %vm656_vm2 = vcmask 588800  }
   0xe   : > { %848 = vmatprep.mubr.msk.f32.mxu0 %vm968_vm0, %v967_v0  ;;  %869 = vmatprep.mubr.msk.f32.mxu1 %vm968_vm0, %v967_v0  ;;  %v777_v34 = vld [vmem:[%s1177_s1 + $0x18] sm:$0xff]  ;;  %s202_s6 = scalar_lea.vmem %s1179_s3, %s744_s30 }
   0xf   : > { %942 = vset.pattern.permute.xlu0 %v969_v2  ;;  %s1023_s21 = scalar_lea.vmem %s1176_s0, %s914_s18 }
  0x10   : > { %652 = vperm.xlu0 %942, %v203_v1   ;;  %v1026_v3 = vld [vmem:[%s1023_s21 + $0x41] sm:$0xff]  ;;  %v1035_v5 = vld [vmem:[%s1023_s21 + $0x39] sm:$0xff]  ;;  %v1044_v7 = vld [vmem:[%s1023_s21 + $0x31] sm:$0xff] }
  0x11   : > { %v212_v4 = vld [vmem:[%s1023_s21 + $0x40] sm:$0xff]  ;;  %831 = vmatpush3.xpose.msk.msra.mxu0 %vm225_vm1, %v1026_v3  ;;  %v211_v6 = vld [vmem:[%s1023_s21 + $0x38] sm:$0xff]  ;;  %v210_v8 = vld [vmem:[%s1023_s21 + $0x30] sm:$0xff] }
  0x12   : > { %852 = vmatpush3.xpose.msk.msra.mxu1 %vm225_vm1, %v212_v4  ;;  %832 = vmatprep.subr.mxu0 %v967_v0  ;;  %v1053_v9 = vld [vmem:[%s1023_s21 + $0x29] sm:$0xff]  ;;  %v1062_v11 = vld [vmem:[%s1023_s21 + $0x21] sm:$0xff]  ;;  %v217_v13 = vld [vmem:[%s1023_s21 + $0x19] sm:$0xff] }
  0x13   : > { %853 = vmatprep.subr.mxu1 %v967_v0  ;;  %v209_v10 = vld [vmem:[%s1023_s21 + $0x28] sm:$0xff]  ;;  %v208_v12 = vld [vmem:[%s1023_s21 + $0x20] sm:$0xff]  ;;  %v207_v14 = vld [vmem:[%s1023_s21 + $0x18] sm:$0xff] }
  0x14   : > { %v216_v15 = vld [vmem:[%s1023_s21 + $0x11] sm:$0xff]  ;;  %v215_v17 = vld [vmem:[%s1023_s21 + $0x9] sm:$0xff]  ;;  %v214_v19 = vld [vmem:[%s1023_s21 + $0x1] sm:$0xff] }
  0x15   : > { %833 = vmatpush3.xpose.msk.msra.mxu0 %vm225_vm1, %v1035_v5  ;;  %v206_v16 = vld [vmem:[%s1023_s21 + $0x10] sm:$0xff]  ;;  %v205_v18 = vld [vmem:[%s1023_s21 + $0x8] sm:$0xff]  ;;  %v204_v20 = vld [vmem:[%s1023_s21] sm:$0xff] }
  0x16   : > { %854 = vmatpush3.xpose.msk.msra.mxu1 %vm225_vm1, %v211_v6  ;;  %834 = vmatprep.subr.mxu0 %v967_v0  ;;  %v434_v23 = vld [vmem:[%s1023_s21 + $0x49] sm:$0xff]  ;;  %v544_v26 = vld [vmem:[%s1023_s21 + $0x3a] sm:$0xff]  ;;  %v543_v27 = vld [vmem:[%s1023_s21 + $0x32] sm:$0xff] }
  0x17   : > { %855 = vmatprep.subr.mxu1 %v967_v0  ;;  %v546_v24 = vld [vmem:[%s1023_s21 + $0x4a] sm:$0xff]  ;;  %v545_v25 = vld [vmem:[%s1023_s21 + $0x42] sm:$0xff]  ;;  %v540_v30 = vld [vmem:[%s1023_s21 + $0x1a] sm:$0xff] }
  0x18   : > { %v542_v28 = vld [vmem:[%s1023_s21 + $0x2a] sm:$0xff]  ;;  %v541_v29 = vld [vmem:[%s1023_s21 + $0x22] sm:$0xff]  ;;  %v539_v31 = vld [vmem:[%s1023_s21 + $0x12] sm:$0xff] }
  0x19   : > { %835 = vmatpush3.xpose.msk.msra.mxu0 %vm225_vm1, %v1044_v7  ;;  %v538_v32 = vld [vmem:[%s1023_s21 + $0xa] sm:$0xff] }
  0x1a   : > { %856 = vmatpush3.xpose.msk.msra.mxu1 %vm225_vm1, %v210_v8  ;;  %836 = vmatprep.subr.mxu0 %v967_v0 }
  0x1b   : > { %857 = vmatprep.subr.mxu1 %v967_v0 }
  0x1d   : > { %837 = vmatpush3.xpose.msk.msra.mxu0 %vm225_vm1, %v1053_v9 }
  0x1e   : > { %858 = vmatpush3.xpose.msk.msra.mxu1 %vm225_vm1, %v209_v10  ;;  %838 = vmatprep.subr.mxu0 %v967_v0 }
  0x1f   : > { %859 = vmatprep.subr.mxu1 %v967_v0 }
  0x21   : > { %839 = vmatpush3.xpose.msk.msra.mxu0 %vm225_vm1, %v1062_v11 }
  0x22   : > { %860 = vmatpush3.xpose.msk.msra.mxu1 %vm225_vm1, %v208_v12  ;;  %840 = vmatprep.subr.mxu0 %v967_v0 }
  0x23   : > { %861 = vmatprep.subr.mxu1 %v967_v0 }
  0x25   : > { %841 = vmatpush3.xpose.msk.msra.mxu0 %vm225_vm1, %v217_v13 }
  0x26   : > { %862 = vmatpush3.xpose.msk.msra.mxu1 %vm225_vm1, %v207_v14  ;;  %842 = vmatprep.subr.mxu0 %v967_v0 }
  0x27   : > { %863 = vmatprep.subr.mxu1 %v967_v0 }
  0x29   : > { %843 = vmatpush3.xpose.msk.msra.mxu0 %vm225_vm1, %v216_v15 }
  0x2a   : > { %864 = vmatpush3.xpose.msk.msra.mxu1 %vm225_vm1, %v206_v16  ;;  %844 = vmatprep.subr.mxu0 %v967_v0 }
  0x2b   : > { %865 = vmatprep.subr.mxu1 %v967_v0 }
  0x2d   : > { %845 = vmatpush3.xpose.msk.msra.mxu0 %vm225_vm1, %v215_v17 }
  0x2e   : > { %866 = vmatpush3.xpose.msk.msra.mxu1 %vm225_vm1, %v205_v18  ;;  %846 = vmatprep.subr.mxu0 %v967_v0 }
  0x2f   : > { %867 = vmatprep.subr.mxu1 %v967_v0 }
  0x31   : > { %847 = vmatpush3.xpose.msk.msra.mxu0 %vm225_vm1, %v214_v19 }
  0x32   : > { %868 = vmatpush3.xpose.msk.msra.mxu1 %vm225_vm1, %v204_v20  ;;  %872 = vmatprep.subr.mxu0 %v967_v0 }
  0x33   : > { %893 = vmatprep.subr.mxu1 %v967_v0 }
  0x34   : > { %849 = vmatmul.mubr.msk.f32.vlgmr.msra.gmra.mxu0 %vm225_vm1, %v745_v21 }
  0x35   : > { %870 = vmatmul.mubr.msk.f32.vlgmr.msra.gmra.mxu1 %vm225_vm1, %v213_v22  ;;  %873 = vmatpush3.xpose.msk.msra.mxu0 %vm225_vm1, %v434_v23 }
  0x36   : > { %894 = vmatpush3.xpose.msk.msra.mxu1 %vm225_vm1, %v546_v24  ;;  %874 = vmatprep.subr.mxu0 %v967_v0 }
  0x37   : > { %895 = vmatprep.subr.mxu1 %v967_v0  ;;  %890 = vmatprep.mubr.msk.f32.mxu0 %vm968_vm0, %v967_v0 }
  0x38   : > { %911 = vmatprep.mubr.msk.f32.mxu1 %vm968_vm0, %v967_v0 }
  0x39   : > { %875 = vmatpush3.xpose.msk.msra.mxu0 %vm225_vm1, %v1026_v3 }
  0x3a   : > { %896 = vmatpush3.xpose.msk.msra.mxu1 %vm225_vm1, %v545_v25  ;;  %876 = vmatprep.subr.mxu0 %v967_v0 }
  0x3b   : > { %897 = vmatprep.subr.mxu1 %v967_v0 }
  0x3d   : > { %877 = vmatpush3.xpose.msk.msra.mxu0 %vm225_vm1, %v1035_v5 }
  0x3e   : > { %898 = vmatpush3.xpose.msk.msra.mxu1 %vm225_vm1, %v544_v26  ;;  %878 = vmatprep.subr.mxu0 %v967_v0 }
  0x3f   : > { %899 = vmatprep.subr.mxu1 %v967_v0 }
  0x41   : > { %879 = vmatpush3.xpose.msk.msra.mxu0 %vm225_vm1, %v1044_v7 }
  0x42   : > { %900 = vmatpush3.xpose.msk.msra.mxu1 %vm225_vm1, %v543_v27  ;;  %880 = vmatprep.subr.mxu0 %v967_v0 }
  0x43   : > { %901 = vmatprep.subr.mxu1 %v967_v0 }
  0x45   : > { %881 = vmatpush3.xpose.msk.msra.mxu0 %vm225_vm1, %v1053_v9 }
  0x46   : > { %902 = vmatpush3.xpose.msk.msra.mxu1 %vm225_vm1, %v542_v28  ;;  %882 = vmatprep.subr.mxu0 %v967_v0 }
  0x47   : > { %903 = vmatprep.subr.mxu1 %v967_v0 }
  0x49   : > { %883 = vmatpush3.xpose.msk.msra.mxu0 %vm225_vm1, %v1062_v11 }
  0x4a   : > { %904 = vmatpush3.xpose.msk.msra.mxu1 %vm225_vm1, %v541_v29  ;;  %884 = vmatprep.subr.mxu0 %v967_v0 }
  0x4b   : > { %905 = vmatprep.subr.mxu1 %v967_v0 }
  0x4d   : > { %885 = vmatpush3.xpose.msk.msra.mxu0 %vm225_vm1, %v217_v13 }
  0x4e   : > { %906 = vmatpush3.xpose.msk.msra.mxu1 %vm225_vm1, %v540_v30  ;;  %886 = vmatprep.subr.mxu0 %v967_v0 }
  0x4f   : > { %907 = vmatprep.subr.mxu1 %v967_v0 }
  0x51   : > { %887 = vmatpush3.xpose.msk.msra.mxu0 %vm225_vm1, %v216_v15 }
  0x52   : > { %908 = vmatpush3.xpose.msk.msra.mxu1 %vm225_vm1, %v539_v31  ;;  %888 = vmatprep.subr.mxu0 %v967_v0 }
  0x53   : > { %909 = vmatprep.subr.mxu1 %v967_v0 }
  0x55   : > { %889 = vmatpush3.xpose.msk.msra.mxu0 %vm225_vm1, %v215_v17 }
  0x56   : > { %910 = vmatpush3.xpose.msk.msra.mxu1 %vm225_vm1, %v538_v32 }
  0x58   : > { %891 = vmatmul.mubr.msk.f32.vlgmr.msra.gmra.mxu0 %vm225_vm1, %v766_v33 }
  0x59   : > { %912 = vmatmul.mubr.msk.f32.vlgmr.msra.gmra.mxu1 %vm225_vm1, %v777_v34 }
  0x8b   : > { %v653_v43 = vpop.permute.xlu0 %652 }
  0xf4   : > { %v322_v35 = vpop.f32.mrf.mxu0 }
  0xf5   : > { %v422_v36 = vpop.f32.mrf.mxu1 }
  0xf6   : > { %v850_v37 = vpop.f32.mrf.mxu0  ;;  %v423_v39 = vadd.f32 %v422_v36, %v322_v35 }
  0xf7   : > { %v871_v38 = vpop.f32.mrf.mxu1 }
 0x118   : > { %v533_v40 = vpop.f32.mrf.mxu0 }
 0x119   : > { %v645_v41 = vpop.f32.mrf.mxu1  ;;  %v537_v42 = vadd.f32 %v533_v40, %v423_v39 }
 0x11a   : > { %v892_v44 = vpop.f32.mrf.mxu0 }
 0x11b   : > { %v913_v45 = vpop.f32.mrf.mxu1  ;;  %v649_v46 = vadd.f32 %v645_v41, %v537_v42 }
 0x11d   : > { %v655_v47 = vadd.f32 %v653_v43, %v649_v46 }
 0x11f   : > { %657 = vst.msk [vmem:[%s202_s6] sm:$0xff] %vm656_vm2, %v655_v47 }
 0x120 PF: > { %s13_s14 = sadd.s32 1, %s965_s14   ;;  %s1180_s12 = smov %s961_s13 }
 0x121   : > { %p10_p5 = scmp.ge.s32.totalorder %s13_s14, 4   ;;  %s1181_s13 = smov %s1183_s15 }
 0x123   :  { %12 = sbr.rel (!%p10_p5) target bundleno = 2 (0x2), region = 65 }

</bundles_post_ra>
